<compile_context>
chip_gen: v7x
topology: tpu7x:2x2x1
jax: 0.10.0
libtpu: 0.0.40
codegen_flags: <defaults>
</compile_context>

<pallas_src>
import functools

import jax
import jax.numpy as jnp
from jax import lax
from jax.experimental import pallas as pl
from jax.experimental.pallas import tpu as pltpu


def _round_up(x, m):
    return (x + m - 1) // m * m


def _vmem_capacity_bytes():
    try:
        return int(pltpu.get_tpu_info().vmem_capacity_bytes)
    except Exception:
        return 64 * 1024 * 1024  # conservative (v7x-sized) fallback


def _backwarp_kernel(img_ref, flow_ref, out_ref, *, H, W, Hp, C, h_chunk, clip):
    # img_ref:  (1, C*Hp, W)  NCHW image with H zero-padded to Hp (mult of 8),
    #                         bf16 (default) or f32.
    # flow_ref: (1, 2, T)     flow for this tile of flat output pixels (0:u/x, 1:v/y)
    # out_ref:  (1, C, T)     f32 output tile.
    T = out_ref.shape[2]
    n = pl.program_id(1)

    u = flow_ref[0, 0:1, :]                                   # (1, T)
    v = flow_ref[0, 1:2, :]                                   # (1, T)

    # Recover (gy, gx) of each flat output pixel in this tile.  Float path is
    # exact for H*W < 2**24.  Padded tail lanes (zero-padded flow) compute
    # harmless values that the wrapper slices off.
    lane = lax.broadcasted_iota(jnp.int32, (1, T), 1)
    pf = (n * T + lane).astype(jnp.float32)
    gy = jnp.floor(pf / float(W))
    gx = pf - gy * float(W)

    # Normalization exactly as in the PyTorch module (divide by w/h), then
    # grid_sample(align_corners=True) un-normalization.
    x = gx + u
    y = gy + v
    xn = x / float(W) * 2.0 - 1.0
    yn = y / float(H) * 2.0 - 1.0
    px = (xn + 1.0) * 0.5 * float(W - 1)                      # (1, T)
    py = (yn + 1.0) * 0.5 * float(H - 1)                      # (1, T)

    if clip:
        # padding_mode='border': clamping the sample point is exactly equivalent
        # to clamping corner indices (coincident corners' weights add up).
        px = jnp.clip(px, 0.0, float(W - 1))
        py = jnp.clip(py, 0.0, float(H - 1))
    # padding_mode='zeros' (clip=False): out-of-range corners fall outside the
    # tent support of in-range k (or land on zero-padded rows) -> contribute 0.

    # Bilinear "tent" weight slabs: w(k) = max(0, 1 - |k - p|).  No int casts.
    ky = lax.broadcasted_iota(jnp.int32, (Hp, T), 0).astype(jnp.float32)
    OY = jnp.maximum(0.0, 1.0 - jnp.abs(ky - py))             # (Hp, T) f32
    kx = lax.broadcasted_iota(jnp.int32, (W, T), 0).astype(jnp.float32)
    OX = jnp.maximum(0.0, 1.0 - jnp.abs(kx - px))             # (W, T) f32
    ox = OX.astype(img_ref.dtype)                             # bf16 for the MXU path

    # Stage 1 (MXU) + stage 2 (VPU/XLU), chunked so the (chunk, T) intermediate
    # stays small.  Static loops: C and Hp/h_chunk are small at compile time.
    # TODO(synk): for very large C switch to lax.fori_loop / a channel grid axis.
    for c in range(C):
        acc = None
        for h0 in range(0, Hp, h_chunk):
            hs = min(h_chunk, Hp - h0)
            img_c = img_ref[0, c * Hp + h0:c * Hp + h0 + hs, :]            # (hs, W)
            a = jnp.dot(img_c, ox, preferred_element_type=jnp.float32)     # (hs, T)
            part = jnp.sum(a * OY[h0:h0 + hs, :], axis=0, keepdims=True)   # (1, T)
            acc = part if acc is None else acc + part
        out_ref[0, c:c + 1, :] = acc.astype(out_ref.dtype)


def back_warp(img, flow, clip=True, *, tile_n=None, h_chunk=None, use_bf16_mxu=True):
    """img: (B, C, H, W) float32, flow: (B, 2, H, W) float32 -> (B, C, H, W)."""
    B, C, H, W = img.shape
    assert flow.shape == (B, 2, H, W)
    HW = H * W
    assert HW < (1 << 24), "float pixel-index recovery requires H*W < 2**24"
    out_dtype = img.dtype

    vmem_cap = _vmem_capacity_bytes()
    # Leave headroom under physical capacity (128 MiB v5e/v6e, 64 MiB v7x).
    vmem_limit = min(96 * 1024 * 1024, (vmem_cap * 3) // 4)

    # Lane tile over output pixels (multiple of 128): bigger T = more MXU N per
    # push and fewer grid steps; cap lower on v7x (less VMEM).
    if tile_n is None:
        tile_n = 1024 if vmem_cap >= 100 * 1024 * 1024 else 512
        tile_n = min(tile_n, _round_up(HW, 128))
    assert tile_n % 128 == 0

    # Pad H to a multiple of 8 (sublane-aligned per-channel slices; padded rows
    # are zero so they never contribute).  (B,C,Hp,W)->(B,C*Hp,W) is a free
    # reshape -- no HBM transpose.
    Hp = _round_up(H, 8)
    if Hp != H:
        img = jnp.pad(img, ((0, 0), (0, 0), (0, Hp - H), (0, 0)))
    img2 = img.reshape(B, C * Hp, W)
    if use_bf16_mxu:
        img2 = img2.astype(jnp.bfloat16)   # hoisted cast: once in HBM, halves the VMEM block

    if h_chunk is None:
        h_chunk = min(Hp, 256)
    h_chunk = _round_up(min(h_chunk, Hp), 8)

    HW_pad = _round_up(HW, tile_n)
    flow_flat = flow.reshape(B, 2, HW)
    if HW_pad != HW:
        flow_flat = jnp.pad(flow_flat, ((0, 0), (0, 0), (0, HW_pad - HW)))

    # Resident-VMEM estimate: single-buffered image block + double-buffered
    # flow/out blocks + weight slabs + one stage-1 chunk (+ slack).
    itemsize = 2 if use_bf16_mxu else 4
    est = (C * Hp * W * itemsize                 # image block (Buffered(1))
           + 2 * 2 * tile_n * 4                  # flow blocks (double-buffered)
           + 2 * C * tile_n * 4                  # out blocks (double-buffered)
           + (Hp + W) * tile_n * 4               # OY, OX (f32)
           + W * tile_n * itemsize               # OX cast for the MXU
           + 2 * h_chunk * tile_n * 4            # stage-1 chunk (x2 slack)
           + (2 << 20))                          # misc
    if est > vmem_limit:
        # TODO(synk): large-frame fallback that DMAs only a source-row band
        # bounded by max|flow| (scalar-prefetch driven) instead of keeping the
        # whole per-batch image resident.
        raise ValueError(
            f"BackWarp working set ~{est >> 20} MiB exceeds VMEM budget "
            f"{vmem_limit >> 20} MiB; reduce tile_n/h_chunk or use bf16.")

    kernel = functools.partial(_backwarp_kernel, H=H, W=W, Hp=Hp, C=C,
                               h_chunk=h_chunk, clip=clip)
    out_flat = pl.pallas_call(
        kernel,
        out_shape=jax.ShapeDtypeStruct((B, C, HW_pad), out_dtype),
        grid_spec=pltpu.PrefetchScalarGridSpec(
            num_scalar_prefetch=0,
            grid=(B, HW_pad // tile_n),
            in_specs=[
                # Per-batch image block: grid-invariant across the tile axis ->
                # fetched once per b, single-buffered (halves its VMEM footprint).
                pl.BlockSpec((1, C * Hp, W), lambda b, n: (b, 0, 0),
                             pipeline_mode=pl.Buffered(1)),
                pl.BlockSpec((1, 2, tile_n), lambda b, n: (b, 0, n)),
            ],
            out_specs=pl.BlockSpec((1, C, tile_n), lambda b, n: (b, 0, n)),
        ),
        # Batch leads so v7x's two TensorCores split on B when possible (each
        # core keeps its own image block); no-op on single-core v5e/v6e.
        compiler_params=pltpu.CompilerParams(
            dimension_semantics=("parallel", "parallel"),
            vmem_limit_bytes=int(vmem_limit),
        ),
    )(img2, flow_flat)

    return out_flat[:, :, :HW].reshape(B, C, H, W)


def back_warp_ref(img, flow, clip=True):
    """Pure-JAX reference matching torch grid_sample(bilinear, align_corners=True)."""
    B, C, H, W = img.shape
    gx = jnp.arange(W, dtype=jnp.float32)[None, None, :]
    gy = jnp.arange(H, dtype=jnp.float32)[None, :, None]
    x = gx + flow[:, 0]
    y = gy + flow[:, 1]
    xn = x / W * 2.0 - 1.0
    yn = y / H * 2.0 - 1.0
    px = (xn + 1.0) * 0.5 * (W - 1)
    py = (yn + 1.0) * 0.5 * (H - 1)
    x0 = jnp.floor(px)
    y0 = jnp.floor(py)
    wx1 = px - x0
    wx0 = 1.0 - wx1
    wy1 = py - y0
    wy0 = 1.0 - wy1
    x0i = x0.astype(jnp.int32)
    y0i = y0.astype(jnp.int32)

    def gather(xi, yi, wgt):
        if not clip:
            valid = (xi >= 0) & (xi <= W - 1) & (yi >= 0) & (yi <= H - 1)
            wgt = jnp.where(valid, wgt, 0.0)
        xc = jnp.clip(xi, 0, W - 1)
        yc = jnp.clip(yi, 0, H - 1)
        idx = (yc * W + xc).reshape(B, 1, H * W)
        img_flat = img.reshape(B, C, H * W)
        vals = jnp.take_along_axis(img_flat, jnp.broadcast_to(idx, (B, C, H * W)), axis=2)
        return vals.reshape(B, C, H, W) * wgt[:, None]

    out = (gather(x0i, y0i, wx0 * wy0) + gather(x0i + 1, y0i, wx1 * wy0)
           + gather(x0i, y0i + 1, wx0 * wy1) + gather(x0i + 1, y0i + 1, wx1 * wy1))
    return out


if __name__ == "__main__":
    key = jax.random.PRNGKey(0)
    k1, k2, k3, k4 = jax.random.split(key, 4)

    # Primary small case: B=2, C=4, 16x16.  tile_n=128 -> 2 tiles (pipelined grid).
    B, C, H, W = 2, 4, 16, 16
    img = jax.random.normal(k1, (B, C, H, W), dtype=jnp.float32)
    flow = 4.0 * jax.random.normal(k2, (B, 2, H, W), dtype=jnp.float32)  # some OOB samples

    ref_t = back_warp_ref(img, flow, clip=True)
    ref_f = back_warp_ref(img, flow, clip=False)

    # Exact f32 MXU path, both padding modes.
    out_t = jax.block_until_ready(back_warp(img, flow, clip=True, tile_n=128,
                                            use_bf16_mxu=False))
    assert out_t.shape == (B, C, H, W)
    assert jnp.allclose(out_t, ref_t, atol=1e-4, rtol=1e-4), "mismatch (clip=True, f32)"

    out_f = jax.block_until_ready(back_warp(img, flow, clip=False, tile_n=128,
                                            use_bf16_mxu=False))
    assert jnp.allclose(out_f, ref_f, atol=1e-4, rtol=1e-4), "mismatch (clip=False, f32)"

    # Default bf16 MXU path (documented ~1e-3 relative error on pixel values).
    out_b = jax.block_until_ready(back_warp(img, flow, clip=True, tile_n=128))
    assert jnp.allclose(out_b, ref_t, atol=5e-2, rtol=5e-2), "mismatch (clip=True, bf16)"

    # Odd shapes: exercises the Hp (H->16) and HW (240->256) padding paths.
    B2, C2, H2, W2 = 1, 3, 12, 20
    img2 = jax.random.normal(k3, (B2, C2, H2, W2), dtype=jnp.float32)
    flow2 = 3.0 * jax.random.normal(k4, (B2, 2, H2, W2), dtype=jnp.float32)
    out2 = jax.block_until_ready(back_warp(img2, flow2, clip=True, tile_n=128,
                                           use_bf16_mxu=False))
    ref2 = back_warp_ref(img2, flow2, clip=True)
    assert out2.shape == (B2, C2, H2, W2)
    assert jnp.allclose(out2, ref2, atol=1e-4, rtol=1e-4), "mismatch (odd shapes)"

    print("KERNEL_OK")
</pallas_src>

<mosaic_0001>
module attributes {stable_mosaic.version = 11 : i64} {
  func.func @_backwarp_kernel(%arg0: i32, %arg1: i32, %arg2: memref<1x64x16xf32, #tpu.memory_space<vmem>>, %arg3: memref<1x2x128xf32, #tpu.memory_space<vmem>>, %arg4: memref<1x4x128xf32, #tpu.memory_space<vmem>>) attributes {dimension_semantics = [#tpu.dimension_semantics<parallel>, #tpu.dimension_semantics<parallel>], iteration_bounds = array<i64: 2, 2>, scalar_prefetch = 0 : i64, scratch_operands = 0 : i64, tpu.core_type = #tpu.core_type<tc>, window_params = [{pipeline_mode = #tpu.pipeline_mode<synchronous>, transform_indices = @transform_0, window_bounds = array<i64: 1, 64, 16>}, {transform_indices = @transform_1, window_bounds = array<i64: 1, 2, 128>}, {transform_indices = @transform_2, window_bounds = array<i64: 1, 4, 128>}]} {
    %c0 = arith.constant 0 : index
    %c0_0 = arith.constant 0 : index
    %c0_1 = arith.constant 0 : index
    %0 = vector.load %arg3[%c0, %c0_0, %c0_1] : memref<1x2x128xf32, #tpu.memory_space<vmem>>, vector<1x1x128xf32>
    %1 = vector.shape_cast %0 : vector<1x1x128xf32> to vector<1x128xf32>
    %c0_2 = arith.constant 0 : index
    %c1 = arith.constant 1 : index
    %c0_3 = arith.constant 0 : index
    %2 = vector.load %arg3[%c0_2, %c1, %c0_3] : memref<1x2x128xf32, #tpu.memory_space<vmem>>, vector<1x1x128xf32>
    %3 = vector.shape_cast %2 : vector<1x1x128xf32> to vector<1x128xf32>
    %4 = tpu.iota {dimensions = array<i32: 1>} : vector<1x128xi32>
    %c128_i32 = arith.constant 128 : i32
    %5 = arith.muli %arg1, %c128_i32 : i32
    %6 = vector.broadcast %5 : i32 to vector<1x128xi32>
    %7 = arith.addi %6, %4 : vector<1x128xi32>
    %8 = arith.sitofp %7 : vector<1x128xi32> to vector<1x128xf32>
    %cst = arith.constant 1.600000e+01 : f32
    %9 = vector.broadcast %cst : f32 to vector<1x128xf32>
    %10 = arith.divf %8, %9 : vector<1x128xf32>
    %11 = math.floor %10 : vector<1x128xf32>
    %cst_4 = arith.constant 1.600000e+01 : f32
    %12 = vector.broadcast %cst_4 : f32 to vector<1x128xf32>
    %13 = arith.mulf %11, %12 : vector<1x128xf32>
    %14 = arith.subf %8, %13 : vector<1x128xf32>
    %15 = arith.addf %14, %1 : vector<1x128xf32>
    %16 = arith.addf %11, %3 : vector<1x128xf32>
    %cst_5 = arith.constant 1.600000e+01 : f32
    %17 = vector.broadcast %cst_5 : f32 to vector<1x128xf32>
    %18 = arith.divf %15, %17 : vector<1x128xf32>
    %cst_6 = arith.constant 2.000000e+00 : f32
    %19 = vector.broadcast %cst_6 : f32 to vector<1x128xf32>
    %20 = arith.mulf %18, %19 : vector<1x128xf32>
    %cst_7 = arith.constant 1.000000e+00 : f32
    %21 = vector.broadcast %cst_7 : f32 to vector<1x128xf32>
    %22 = arith.subf %20, %21 : vector<1x128xf32>
    %cst_8 = arith.constant 1.600000e+01 : f32
    %23 = vector.broadcast %cst_8 : f32 to vector<1x128xf32>
    %24 = arith.divf %16, %23 : vector<1x128xf32>
    %cst_9 = arith.constant 2.000000e+00 : f32
    %25 = vector.broadcast %cst_9 : f32 to vector<1x128xf32>
    %26 = arith.mulf %24, %25 : vector<1x128xf32>
    %cst_10 = arith.constant 1.000000e+00 : f32
    %27 = vector.broadcast %cst_10 : f32 to vector<1x128xf32>
    %28 = arith.subf %26, %27 : vector<1x128xf32>
    %cst_11 = arith.constant 1.000000e+00 : f32
    %29 = vector.broadcast %cst_11 : f32 to vector<1x128xf32>
    %30 = arith.addf %22, %29 : vector<1x128xf32>
    %cst_12 = arith.constant 5.000000e-01 : f32
    %31 = vector.broadcast %cst_12 : f32 to vector<1x128xf32>
    %32 = arith.mulf %30, %31 : vector<1x128xf32>
    %cst_13 = arith.constant 1.500000e+01 : f32
    %33 = vector.broadcast %cst_13 : f32 to vector<1x128xf32>
    %34 = arith.mulf %32, %33 : vector<1x128xf32>
    %cst_14 = arith.constant 1.000000e+00 : f32
    %35 = vector.broadcast %cst_14 : f32 to vector<1x128xf32>
    %36 = arith.addf %28, %35 : vector<1x128xf32>
    %cst_15 = arith.constant 5.000000e-01 : f32
    %37 = vector.broadcast %cst_15 : f32 to vector<1x128xf32>
    %38 = arith.mulf %36, %37 : vector<1x128xf32>
    %cst_16 = arith.constant 1.500000e+01 : f32
    %39 = vector.broadcast %cst_16 : f32 to vector<1x128xf32>
    %40 = arith.mulf %38, %39 : vector<1x128xf32>
    %cst_17 = arith.constant 0.000000e+00 : f32
    %cst_18 = arith.constant 1.500000e+01 : f32
    %41 = vector.broadcast %cst_17 : f32 to vector<1x128xf32>
    %42 = arith.maximumf %41, %34 : vector<1x128xf32>
    %43 = vector.broadcast %cst_18 : f32 to vector<1x128xf32>
    %44 = arith.minimumf %43, %42 : vector<1x128xf32>
    %cst_19 = arith.constant 0.000000e+00 : f32
    %cst_20 = arith.constant 1.500000e+01 : f32
    %45 = vector.broadcast %cst_19 : f32 to vector<1x128xf32>
    %46 = arith.maximumf %45, %40 : vector<1x128xf32>
    %47 = vector.broadcast %cst_20 : f32 to vector<1x128xf32>
    %48 = arith.minimumf %47, %46 : vector<1x128xf32>
    %49 = tpu.iota {dimensions = array<i32: 0>} : vector<16x128xi32>
    %50 = arith.sitofp %49 : vector<16x128xi32> to vector<16x128xf32>
    %51 = vector.broadcast %48 : vector<1x128xf32> to vector<16x128xf32>
    %52 = arith.subf %50, %51 : vector<16x128xf32>
    %53 = math.absf %52 : vector<16x128xf32>
    %cst_21 = arith.constant 1.000000e+00 : f32
    %54 = vector.broadcast %cst_21 : f32 to vector<16x128xf32>
    %55 = arith.subf %54, %53 : vector<16x128xf32>
    %cst_22 = arith.constant 0.000000e+00 : f32
    %56 = vector.broadcast %cst_22 : f32 to vector<16x128xf32>
    %57 = arith.maximumf %56, %55 : vector<16x128xf32>
    %58 = tpu.iota {dimensions = array<i32: 0>} : vector<16x128xi32>
    %59 = arith.sitofp %58 : vector<16x128xi32> to vector<16x128xf32>
    %60 = vector.broadcast %44 : vector<1x128xf32> to vector<16x128xf32>
    %61 = arith.subf %59, %60 : vector<16x128xf32>
    %62 = math.absf %61 : vector<16x128xf32>
    %cst_23 = arith.constant 1.000000e+00 : f32
    %63 = vector.broadcast %cst_23 : f32 to vector<16x128xf32>
    %64 = arith.subf %63, %62 : vector<16x128xf32>
    %cst_24 = arith.constant 0.000000e+00 : f32
    %65 = vector.broadcast %cst_24 : f32 to vector<16x128xf32>
    %66 = arith.maximumf %65, %64 : vector<16x128xf32>
    %c0_25 = arith.constant 0 : index
    %c0_26 = arith.constant 0 : index
    %c0_27 = arith.constant 0 : index
    %67 = vector.load %arg2[%c0_25, %c0_26, %c0_27] : memref<1x64x16xf32, #tpu.memory_space<vmem>>, vector<1x16x16xf32>
    %68 = vector.shape_cast %67 : vector<1x16x16xf32> to vector<16x16xf32>
    %cst_28 = arith.constant dense<0.000000e+00> : vector<16x128xf32>
    %69 = tpu.matmul %68, %66, %cst_28 {dimension_numbers = #tpu.dot_dimension_numbers<[1], [0], [0], [1], [0, 0, 1, 1], [], []>} : vector<16x16xf32>, vector<16x128xf32>, vector<16x128xf32> -> vector<16x128xf32>
    %70 = arith.mulf %69, %57 : vector<16x128xf32>
    %cst_29 = arith.constant dense<0.000000e+00> : vector<128xf32>
    %71 = vector.multi_reduction <add>, %70, %cst_29 [0] : vector<16x128xf32> to vector<128xf32>
    %72 = vector.shape_cast %71 : vector<128xf32> to vector<1x128xf32>
    %c0_30 = arith.constant 0 : index
    %c0_31 = arith.constant 0 : index
    %c0_32 = arith.constant 0 : index
    %73 = vector.load %arg4[%c0_30, %c0_31, %c0_32] : memref<1x4x128xf32, #tpu.memory_space<vmem>>, vector<1x1x128xf32>
    %74 = vector.shape_cast %73 : vector<1x1x128xf32> to vector<1x128xf32>
    %75 = vector.shape_cast %72 : vector<1x128xf32> to vector<1x1x128xf32>
    tpu.vector_store %arg4[%c0_30, %c0_31, %c0_32], %75 {strides = array<i32>} : memref<1x4x128xf32, #tpu.memory_space<vmem>>, vector<1x1x128xf32>,
    %c0_33 = arith.constant 0 : index
    %c16 = arith.constant 16 : index
    %c0_34 = arith.constant 0 : index
    %76 = vector.load %arg2[%c0_33, %c16, %c0_34] : memref<1x64x16xf32, #tpu.memory_space<vmem>>, vector<1x16x16xf32>
    %77 = vector.shape_cast %76 : vector<1x16x16xf32> to vector<16x16xf32>
    %cst_35 = arith.constant dense<0.000000e+00> : vector<16x128xf32>
    %78 = tpu.matmul %77, %66, %cst_35 {dimension_numbers = #tpu.dot_dimension_numbers<[1], [0], [0], [1], [0, 0, 1, 1], [], []>} : vector<16x16xf32>, vector<16x128xf32>, vector<16x128xf32> -> vector<16x128xf32>
    %79 = arith.mulf %78, %57 : vector<16x128xf32>
    %cst_36 = arith.constant dense<0.000000e+00> : vector<128xf32>
    %80 = vector.multi_reduction <add>, %79, %cst_36 [0] : vector<16x128xf32> to vector<128xf32>
    %81 = vector.shape_cast %80 : vector<128xf32> to vector<1x128xf32>
    %c0_37 = arith.constant 0 : index
    %c1_38 = arith.constant 1 : index
    %c0_39 = arith.constant 0 : index
    %82 = vector.load %arg4[%c0_37, %c1_38, %c0_39] : memref<1x4x128xf32, #tpu.memory_space<vmem>>, vector<1x1x128xf32>
    %83 = vector.shape_cast %82 : vector<1x1x128xf32> to vector<1x128xf32>
    %84 = vector.shape_cast %81 : vector<1x128xf32> to vector<1x1x128xf32>
    tpu.vector_store %arg4[%c0_37, %c1_38, %c0_39], %84 {strides = array<i32>} : memref<1x4x128xf32, #tpu.memory_space<vmem>>, vector<1x1x128xf32>,
    %c0_40 = arith.constant 0 : index
    %c32 = arith.constant 32 : index
    %c0_41 = arith.constant 0 : index
    %85 = vector.load %arg2[%c0_40, %c32, %c0_41] : memref<1x64x16xf32, #tpu.memory_space<vmem>>, vector<1x16x16xf32>
    %86 = vector.shape_cast %85 : vector<1x16x16xf32> to vector<16x16xf32>
    %cst_42 = arith.constant dense<0.000000e+00> : vector<16x128xf32>
    %87 = tpu.matmul %86, %66, %cst_42 {dimension_numbers = #tpu.dot_dimension_numbers<[1], [0], [0], [1], [0, 0, 1, 1], [], []>} : vector<16x16xf32>, vector<16x128xf32>, vector<16x128xf32> -> vector<16x128xf32>
    %88 = arith.mulf %87, %57 : vector<16x128xf32>
    %cst_43 = arith.constant dense<0.000000e+00> : vector<128xf32>
    %89 = vector.multi_reduction <add>, %88, %cst_43 [0] : vector<16x128xf32> to vector<128xf32>
    %90 = vector.shape_cast %89 : vector<128xf32> to vector<1x128xf32>
    %c0_44 = arith.constant 0 : index
    %c2 = arith.constant 2 : index
    %c0_45 = arith.constant 0 : index
    %91 = vector.load %arg4[%c0_44, %c2, %c0_45] : memref<1x4x128xf32, #tpu.memory_space<vmem>>, vector<1x1x128xf32>
    %92 = vector.shape_cast %91 : vector<1x1x128xf32> to vector<1x128xf32>
    %93 = vector.shape_cast %90 : vector<1x128xf32> to vector<1x1x128xf32>
    tpu.vector_store %arg4[%c0_44, %c2, %c0_45], %93 {strides = array<i32>} : memref<1x4x128xf32, #tpu.memory_space<vmem>>, vector<1x1x128xf32>,
    %c0_46 = arith.constant 0 : index
    %c48 = arith.constant 48 : index
    %c0_47 = arith.constant 0 : index
    %94 = vector.load %arg2[%c0_46, %c48, %c0_47] : memref<1x64x16xf32, #tpu.memory_space<vmem>>, vector<1x16x16xf32>
    %95 = vector.shape_cast %94 : vector<1x16x16xf32> to vector<16x16xf32>
    %cst_48 = arith.constant dense<0.000000e+00> : vector<16x128xf32>
    %96 = tpu.matmul %95, %66, %cst_48 {dimension_numbers = #tpu.dot_dimension_numbers<[1], [0], [0], [1], [0, 0, 1, 1], [], []>} : vector<16x16xf32>, vector<16x128xf32>, vector<16x128xf32> -> vector<16x128xf32>
    %97 = arith.mulf %96, %57 : vector<16x128xf32>
    %cst_49 = arith.constant dense<0.000000e+00> : vector<128xf32>
    %98 = vector.multi_reduction <add>, %97, %cst_49 [0] : vector<16x128xf32> to vector<128xf32>
    %99 = vector.shape_cast %98 : vector<128xf32> to vector<1x128xf32>
    %c0_50 = arith.constant 0 : index
    %c3 = arith.constant 3 : index
    %c0_51 = arith.constant 0 : index
    %100 = vector.load %arg4[%c0_50, %c3, %c0_51] : memref<1x4x128xf32, #tpu.memory_space<vmem>>, vector<1x1x128xf32>
    %101 = vector.shape_cast %100 : vector<1x1x128xf32> to vector<1x128xf32>
    %102 = vector.shape_cast %99 : vector<1x128xf32> to vector<1x1x128xf32>
    tpu.vector_store %arg4[%c0_50, %c3, %c0_51], %102 {strides = array<i32>} : memref<1x4x128xf32, #tpu.memory_space<vmem>>, vector<1x1x128xf32>,
    return
  }
  func.func @transform_0(%arg0: i32, %arg1: i32) -> (i32, i32, i32) {
    %c0_i32 = arith.constant 0 : i32
    %c0_i32_0 = arith.constant 0 : i32
    %c0_i32_1 = arith.constant 0 : i32
    return %arg0, %c0_i32, %c0_i32_0 : i32, i32, i32
  }
  func.func @transform_1(%arg0: i32, %arg1: i32) -> (i32, i32, i32) {
    %c0_i32 = arith.constant 0 : i32
    %c0_i32_0 = arith.constant 0 : i32
    return %arg0, %c0_i32, %arg1 : i32, i32, i32
  }
  func.func @transform_2(%arg0: i32, %arg1: i32) -> (i32, i32, i32) {
    %c0_i32 = arith.constant 0 : i32
    %c0_i32_0 = arith.constant 0 : i32
    return %arg0, %c0_i32, %arg1 : i32, i32, i32
  }
}

</mosaic_0001>

<bundles_post_ra>
// kernel: tpu_custom_call.1
= control target key start
LH: loop header
LB: loop body
LE: loop exit
PB: predicated region body
PF: predicated region fallthrough
CT: control target
= control target key end

     0   :  { %7 = vsyncpa [#allocation3], 0  ;;  %s1162_s0 = inlined_call_operand.vmem [shape: f32[2,64,16], index: 0, kind: input, shape index: {}]   ;;  %s1163_s1 = inlined_call_operand.vmem [shape: f32[2,2,256], index: 1, kind: input, shape index: {}]   ;;  %s1164_s2 = inlined_call_operand.hbm [shape: f32[2,4,256], index: 2, kind: output, shape index: {}]  }
   0x1   :  { %9 = vsyncpa [#allocation3 + $0x1], 0  ;;  %s999_s9 = smov 0   ;;  %s1001_s10 = smov 0  }
   0x2   :  { %s1003_s11 = smov 0   ;;  %s1005_s12 = smov 0  }
   0x3   :  { %s1007_s13 = smov 0   ;;  %s1009_s14 = smov 0  }
   0x4   :  { %s1011_s15 = smov 0   ;;  %s1013_s16 = smov 0  }
   0x5 LB: > { %s729_s17 = sadd.s32 4294967295, %s981_s16   ;;  %s730_s18 = sadd.s32 4294967294, %s981_s16   ;;  %s981_s16 = sphi %s1013_s16, %s15_s16   ;;  %s977_s15 = sphi %s1011_s15, %s1173_s15   ;;  %s973_s14 = sphi %s1009_s14, %s1172_s14   ;;  %s969_s13 = sphi %s1007_s13, %s1171_s13   ;;  %s965_s12 = sphi %s1005_s12, %s1170_s12   ;;  %s961_s11 = sphi %s1003_s11, %s1169_s11   ;;  %s957_s10 = sphi %s1001_s10, %s1168_s10   ;;  %s953_s9 = sphi %s999_s9, %s1167_s9  }
   0x6   : > { %s24_s19 = sadd.s32 1, %s973_s14  ;;  %s27_s20 = sadd.s32 1, %s977_s15 }
   0x7   : > { %p25_p0 = scmp.ge.s32.totalorder %s24_s19, 2  ;;  %p100_p1 = scmp.ne.s32.totalorder %s961_s11, %s957_s10 }
   0x8   : > { %p101_p2 = scmp.eq.s32.totalorder %s729_s17, 3  ;;  %p106_p5 = scmp.ne.s32.totalorder %s957_s10, %s953_s9 }
   0x9   : > { %s1175_s19 = smov (%p25_p0, %s24_s19), 0  ;;  %s1177_s20 = smov (!%p25_p0, %s27_s20), %s977_s15 }
   0xa   : > { %s86_s21 = ssub.s32 %s973_s14, %s1175_s19  ;;  %p1050_p3 = por %p101_p2, %p100_p1 }
   0xb   : > { %p29_p4 = scmp.ge.s32.totalorder %s1177_s20, 2  ;;  %p107_p6 = scmp.eq.s32.totalorder %s730_s18, 3 }
   0xc   : > { %p733_p7 = scmp.ge.s32.totalorder %s981_s16, 1  ;;  %p144_p9 = scmp.lt.s32.totalorder %s981_s16, 5 }
   0xd   : > { %s1179_s20 = smov (%p29_p4, %s1177_s20), 0  ;;  %p1059_p8 = por %p107_p6, %p106_p5 }
   0xe   : > { %s85_s24 = ssub.s32 %s977_s15, %s1179_s20  ;;  %s90_s25 = sadd.s32 1, %s961_s11 }
   0xf   : > { %s87_s26 = sor.u32 %s86_s21, %s85_s24  ;;  %p145_p10 = pnand %p733_p7, %p144_p9 }
  0x10   : > { %p88_p11 = scmp.eq.s32.totalorder %s87_s26, 0  ;;  %p174_p12 = scmp.lt.s32.totalorder (!%p145_p10), %s969_s13, 1  ;;  %v189_v0 = vlaneseq (!%p145_p10)  ;;  %vm249_vm0 = vcmask (!%p145_p10), 130048  }
  0x11   : > { %148 = sbr.rel (%p145_p10) target bundleno = 314 (0x13a), region = 28  ;;  %p181_p13 = scmp.lt.s32.totalorder (!%p145_p10), %s965_s12, 1 }
  0x12   : > { %s1068_s27 = scalar_select %p88_p11, %s961_s11, %s90_s25  }
  0x13   : > { %s739_s28 = sshll.u32 (!%p145_p10), %s965_s12, 7  ;;  %v190_v1 = vand.u32 (!%p145_p10), 127, %v189_v0  ;;  %v219_v22 = vshrl.u32 (!%p145_p10), %v189_v0, 7  ;;  %s171_s25 = sand.u32 (!%p145_p10), 1, %s957_s10  }
  0x14   : > { %v192_v2 = vstv (!%p145_p10), %s739_s28  ;;  %s751_s26 = sshll.u32 (!%p145_p10), %s969_s13, 1  ;;  %s734_s28 = sshll.u32 (!%p145_p10), %s171_s25, 2 }
  0x15   : > { %v193_v3 = vadd.s32 (!%p145_p10), %v192_v2, %v190_v1  ;;  %v220_v27 = vadd.s32 (!%p145_p10), 8, %v219_v22  ;;  %v225_v30 = vsub.s32 (!%p145_p10), 0, %v219_v22  ;;  %v221_v36 = vcvt.s32.f32 (!%p145_p10), %v219_v22 }
  0x17   : > { %v194_v4 = vcvt.s32.f32 (!%p145_p10), %v193_v3  ;;  %v222_v33 = vcvt.s32.f32 (!%p145_p10), %v220_v27 }
  0x18   : > { %s175_s29 = scalar_select %p174_p12, %s969_s13, 1 }
  0x19   : > { %s182_s30 = scalar_select %p181_p13, %s965_s12, 1  ;;  %v196_v7 = vmul.f32 0.0625, %v194_v4 }
  0x1a   : > { %s737_s3 = sshll.u32 %s175_s29, 1  ;;  %s755_s4 = sshll.u32 %s175_s29, 6 }
  0x1b   : > { %s184_s5 = sadd.s32 %s737_s3, %s182_s30  ;;  %s1078_s8 = scalar_lea.vmem %s1162_s0, %s755_s4  ;;  %v197_v9 = vfloor.f32 %v196_v7 }
  0x1c   : > { %s738_s17 = sshll.u32 %s184_s5, 1  ;;  %v247_v5 = vld [vmem:[%s1078_s8] sm:$0xff]  ;;  %v341_v6 = vld [vmem:[%s1078_s8 + $0x10] sm:$0xff]  ;;  %v248_v48 = vld [vmem:[%s1078_s8 + $0x8] sm:$0xff]  ;;  %s632_s29 = sadd.s32 %s965_s12, %s751_s26 }
  0x1d   : > { %776 = vmatprep.mubr.msk.f32.mxu0 %vm249_vm0, %v247_v5  ;;  %783 = vmatprep.mubr.msk.f32.mxu1 %vm249_vm0, %v341_v6  ;;  %s186_s24 = scalar_lea.vmem %s1163_s1, %s738_s17  ;;  %v198_v10 = vmul.f32 16.0, %v197_v9  ;;  %v342_v49 = vld [vmem:[%s1078_s8 + $0x18] sm:$0xff]  ;;  %v434_v50 = vld [vmem:[%s1078_s8 + $0x20] sm:$0xff]  ;;  %v527_v51 = vld [vmem:[%s1078_s8 + $0x30] sm:$0xff]  ;;  %s752_s30 = sshll.u32 %s632_s29, 6 }
  0x1e   : > { %v188_v8 = vld [vmem:[%s186_s24 + $0x1] sm:$0x1]  ;;  %v187_v12 = vld [vmem:[%s186_s24] sm:$0x1]  ;;  %v435_v52 = vld [vmem:[%s1078_s8 + $0x28] sm:$0xff]  ;;  %s173_s3 = scalar_lea.vmem [#allocation2], %s734_s28  ;;  %s1107_s6 = scalar_lea.hbm %s1164_s2, %s752_s30 }
  0x1f   : > { %v201_v11 = vadd.f32 %v197_v9, %v188_v8  ;;  %v199_v13 = vsub.f32 %v194_v4, %v198_v10  ;;  %v528_v53 = vld [vmem:[%s1078_s8 + $0x38] sm:$0xff]  ;;  %s636_s13 = sshll.u32 %s173_s3, 4  ;;  %s621_s12 = scalar_lea.sflag [#allocation3], %s171_s25  ;;  %s1109_s13 = int_to_ptr.vmem [resolvable:$true] %s636_s13 }
  0x20   : > { %s887_s7 = scalar_lea.vmem %s1109_s13, 64  ;;  %s983_s8 = smov [#allocation2]  }
  0x21   : > { %v205_v14 = vmul.f32 0.0625, %v201_v11  ;;  %v200_v15 = vadd.f32 %v199_v13, %v187_v12  ;;  %p888_p0 = scmp.ne.s32.totalorder %s1109_s13, %s887_s7  ;;  %s891_s17 = sshll.u32 %s983_s8, 4  ;;  %s892_s17 = int_to_ptr.vmem [resolvable:$false] %s891_s17 }
  0x22   : > { %s893_s18 = scalar_lea.vmem %s892_s17, 128  ;;  %p894_p4 = scmp.lt.s32.totalorder %s1109_s13, %s892_s17 }
  0x23   : > { %v206_v16 = vmul.f32 2.0, %v205_v14  ;;  %v202_v17 = vmul.f32 0.0625, %v200_v15  ;;  %p889_p1 = pnand %p888_p0, %p1050_p3  ;;  %p895_p5 = scmp.lt.s32.totalorder %s893_s18, %s887_s7 }
  0x25   : > { %v741_v18 = vadd.f32 -1.0, %v206_v16  ;;  %v203_v19 = vmul.f32 2.0, %v202_v17  ;;  %p890_p2 = pneg %p889_p1  ;;  %p896_p6 = por %p895_p5, %p894_p4 }
  0x27   : > { %v211_v20 = vadd.f32 1.0, %v741_v18  ;;  %v740_v21 = vadd.f32 -1.0, %v203_v19  ;;  %p897_p7 = pnand %p896_p6, %p890_p2 }
  0x29   : > { %v212_v23 = vmul.f32 0.5, %v211_v20  ;;  %v208_v24 = vadd.f32 1.0, %v740_v21 }
  0x2b   : > { %v213_v25 = vmul.f32 15.0, %v212_v23  ;;  %v209_v26 = vmul.f32 0.5, %v208_v24 }
  0x2d   : > { %v216_v28 = vmax.f32 %v213_v25, 0.0  ;;  %v210_v29 = vmul.f32 15.0, %v209_v26 }
  0x2f   : > { %v217_v31 = vmin.f32 %v216_v28, 15.0  ;;  %v214_v32 = vmax.f32 %v210_v29, 0.0 }
  0x31   : > { %v226_v34 = vrot.slane %v217_v31, %v225_v30  ;;  %v215_v35 = vmin.f32 %v214_v32, 15.0 }
  0x33   : > { %v228_v37 = vsub.f32 %v222_v33, %v226_v34  ;;  %v238_v38 = vrot.slane %v215_v35, %v225_v30  ;;  %v227_v54 = vsub.f32 %v221_v36, %v226_v34 }
  0x35   : > { %v239_v39 = vsub.f32 %v221_v36, %v238_v38  ;;  %v240_v40 = vsub.f32 %v222_v33, %v238_v38  ;;  %v230_v55 = vand.u32 2147483647, %v228_v37  ;;  %v229_v56 = vand.u32 2147483647, %v227_v54 }
  0x37   : > { %v241_v41 = vand.u32 2147483647, %v239_v39  ;;  %v242_v42 = vand.u32 2147483647, %v240_v40  ;;  %v232_v57 = vsub.f32 1.0, %v230_v55  ;;  %v231_v58 = vsub.f32 1.0, %v229_v56 }
  0x39   : > { %v243_v43 = vsub.f32 1.0, %v241_v41  ;;  %v244_v44 = vsub.f32 1.0, %v242_v42  ;;  %v234_v59 = vmax.f32 %v232_v57, 0.0  ;;  %v233_v60 = vmax.f32 %v231_v58, 0.0 }
  0x3b   : > { %v245_v45 = vmax.f32 %v243_v43, 0.0  ;;  %v246_v46 = vmax.f32 %v244_v44, 0.0 }
  0x3d   : > { %v800_v47 = vpack.c.bf16 %v246_v46, %v245_v45 }
  0x3f   : > { %801 = vmatprep.subr.bf16.mxu0 %v800_v47  ;;  %805 = vmatprep.subr.bf16.mxu1 %v800_v47 }
  0x40   : > { %803 = vmatpush3.bf16.msra.mxu0 %v800_v47  ;;  %807 = vmatpush3.bf16.msra.mxu1 %v800_v47 }
  0x41   : > { %809 = vmatprep.subr.bf16.mxu0 %v800_v47  ;;  %813 = vmatprep.subr.bf16.mxu1 %v800_v47 }
  0x43   : > { %777 = vmatmul.mubr.msk.f32.vlgmr.msra.gmra.mrb[0].mxu0 %vm249_vm0, %v248_v48  ;;  %784 = vmatmul.mubr.msk.f32.vlgmr.msra.gmra.mrb[0].mxu1 %vm249_vm0, %v342_v49 }
  0x44   : > { %811 = vmatpush3.bf16.msra.mxu0 %v800_v47  ;;  %815 = vmatpush3.bf16.msra.mxu1 %v800_v47 }
  0x45   : > { %790 = vmatprep.mubr.msk.f32.mxu0 %vm249_vm0, %v434_v50  ;;  %797 = vmatprep.mubr.msk.f32.mxu1 %vm249_vm0, %v527_v51 }
  0x47   : > { %791 = vmatmul.mubr.msk.f32.vlgmr.msra.gmra.mrb[2].mxu0 %vm249_vm0, %v435_v52  ;;  %798 = vmatmul.mubr.msk.f32.vlgmr.msra.gmra.mrb[2].mxu1 %vm249_vm0, %v528_v53 }
 0x116   : > { %v778_v61 = vpop.f32.mrb[0].mxu0  ;;  %v785_v62 = vpop.f32.mrb[0].mxu1 }
 0x117   : > { %v332_v63 = vmul.f32 %v778_v61, %v234_v59  ;;  %v425_v0 = vmul.f32 %v785_v62, %v234_v59  ;;  %v322_v1 = vpop.f32.mrb[1].mxu0  ;;  %v415_v2 = vpop.f32.mrb[1].mxu1 }
 0x118   : > { %v331_v3 = vmul.f32 %v322_v1, %v233_v60  ;;  %v424_v4 = vmul.f32 %v415_v2, %v233_v60 }
 0x11a   : > { %v333_v5 = vadd.f32 %v332_v63, %v331_v3  ;;  %v426_v6 = vadd.f32 %v425_v0, %v424_v4  ;;  %v792_v7 = vpop.f32.mrb[2].mxu0  ;;  %v799_v8 = vpop.f32.mrb[2].mxu1 }
 0x11b   : > { %v518_v9 = vmul.f32 %v792_v7, %v234_v59  ;;  %v611_v10 = vmul.f32 %v799_v8, %v234_v59  ;;  %v508_v11 = vpop.f32.mrb[3].mxu0  ;;  %v601_v12 = vpop.f32.mrb[3].mxu1 }
 0x11c   : > { %v334_v13 = vrot.slane %v333_v5, 4  ;;  %v427_v14 = vrot.slane %v426_v6, 4  ;;  %v517_v15 = vmul.f32 %v508_v11, %v233_v60  ;;  %v610_v16 = vmul.f32 %v601_v12, %v233_v60 }
 0x11e   : > { %v335_v17 = vadd.f32 %v334_v13, %v333_v5  ;;  %v428_v18 = vadd.f32 %v427_v14, %v426_v6  ;;  %v519_v19 = vadd.f32 %v518_v9, %v517_v15  ;;  %v612_v20 = vadd.f32 %v611_v10, %v610_v16 }
 0x120   : > { %v336_v21 = vrot.slane %v335_v17, 2  ;;  %v429_v22 = vrot.slane %v428_v18, 2  ;;  %v520_v23 = vrot.slane %v519_v19, 4  ;;  %v613_v24 = vrot.slane %v612_v20, 4 }
 0x122   : > { %v337_v25 = vadd.f32 %v336_v21, %v335_v17  ;;  %v430_v26 = vadd.f32 %v429_v22, %v428_v18  ;;  %v521_v27 = vadd.f32 %v520_v23, %v519_v19  ;;  %v614_v28 = vadd.f32 %v613_v24, %v612_v20 }
 0x124   : > { %v338_v29 = vrot.slane %v337_v25, 1  ;;  %v431_v30 = vrot.slane %v430_v26, 1  ;;  %v522_v31 = vrot.slane %v521_v27, 2  ;;  %v615_v32 = vrot.slane %v614_v28, 2 }
 0x126   : > { %v339_v33 = vadd.f32 %v338_v29, %v337_v25  ;;  %v432_v34 = vadd.f32 %v431_v30, %v430_v26  ;;  %v523_v35 = vadd.f32 %v522_v31, %v521_v27  ;;  %v616_v36 = vadd.f32 %v615_v32, %v614_v28 }
 0x128   : > { %340 = vst [vmem:[%s173_s3] sm:$0x1] %v339_v33  ;;  %433 = vst [vmem:[%s173_s3 + $0x1] sm:$0x1] %v432_v34  ;;  %v524_v37 = vrot.slane %v523_v35, 1  ;;  %v617_v38 = vrot.slane %v616_v36, 1 }
 0x12a   : > { %v525_v39 = vadd.f32 %v524_v37, %v523_v35  ;;  %v618_v40 = vadd.f32 %v617_v38, %v616_v36 }
 0x12c   : > { %526 = vst [vmem:[%s173_s3 + $0x2] sm:$0x1] %v525_v39  ;;  %619 = vst [vmem:[%s173_s3 + $0x3] sm:$0x1] %v618_v40 }
 0x12d   : > { %900 = shalt.err (!%p897_p7)
}
 0x12e   : > { %s901_s21 = scalar_lea.hbm %s1107_s6, 64  ;;  %s905_s26 = scalar_lea.hbm %s1164_s2, 256 }
 0x12f   : > { %p902_p9 = scmp.ne.s32.totalorder %s1107_s6, %s901_s21  ;;  %p906_p12 = scmp.lt.u32.totalorder %s1107_s6, %s1164_s2 }
 0x130   : > { %p907_p13 = scmp.lt.u32.totalorder %s905_s26, %s901_s21  ;;  %p909_p1 = scmp.lt.u32.totalorder %s901_s21, %s1107_s6 }
 0x131   : > { %p903_p10 = pnand %p902_p9, %p1050_p3 }
 0x132   : > { %p908_p0 = por %p907_p13, %p906_p12 }
 0x133   : > { %p904_p11 = pneg %p903_p10 }
 0x134   : > { %p910_p2 = por %p909_p1, %p908_p0 }
 0x136   : > { %p911_p4 = pnand %p910_p2, %p904_p11 }
 0x138   : > { %914 = shalt.err (!%p911_p4)
}
 0x139   : > { %816 = dma.vmem_to_hbm [thread:$0]  (%p1050_p3), %s1109_s13, 64, %s1107_s6, %s621_s12  }
 0x13a PF: > { %p822_p5 = scmp.ge.s32.totalorder %s981_s16, 2  ;;  %s648_s30 = sand.u32 1, %s953_s9  }
 0x13b   : > { %s649_s3 = scalar_lea.sflag [#allocation3], %s648_s30 }
 0x13c   : > { %p819_p6 = pnand %p822_p5, %p1059_p8 }
 0x13e   : > { %948 = dma.done.wait (!%p819_p6), %s649_s3, 64  }
 0x13f   : > { %950 = vsyncadd (!%p819_p6), %s649_s3, 4294967232  ;;  %s15_s16 = sadd.s32 1, %s981_s16   ;;  %s1167_s9 = smov %s957_s10 }
 0x140   : > { %p12_p7 = scmp.ge.s32.totalorder %s15_s16, 6   ;;  %s1168_s10 = smov %s961_s11 }
 0x141   : > { %s1169_s11 = smov %s1068_s27  ;;  %s1170_s12 = smov %s973_s14 }
 0x142   : > { %s1171_s13 = smov %s977_s15  ;;  %s1172_s14 = smov %s1175_s19 }
 0x143   : > { %s1173_s15 = smov %s1179_s20  ;;  %14 = sbr.rel (!%p12_p7) target bundleno = 5 (0x5), region = 66 }
 0x14a   :  { %654 = vsyncpa [#allocation3], 1 }
 0x14b   :  { %656 = vsyncpa [#allocation3 + $0x1], 1 }

</bundles_post_ra>
